<compile_context>
chip_gen: v7x
topology: tpu7x:2x2x1
jax: 0.10.0
libtpu: 0.0.40
codegen_flags: <defaults>
</compile_context>

<pallas_src>
import jax
import jax.numpy as jnp
from jax import lax
from jax.experimental import pallas as pl
from jax.experimental.pallas import tpu as pltpu  # noqa: F401  (TPU backend)

# Small, module-consistent sizes.
B, S, D, H, FF, EXPAND = 2, 8, 32, 4, 64, 2
DK = D // H            # head dim = 8
N = B * S              # flattened rows = 16
EPS = 1e-6             # LayerNorm epsilon
LANES = 128            # slab / output lane width (lane-dense loads & stores)

# ---- row offsets inside the packed [W_ROWS, 128] f32 weight slab ----------
R_WQKV = 0             # [D, 3D]   wq|wk|wv   (attention scale folded into wq)
R_WO = R_WQKV + D      # [D, D]
R_W1 = R_WO + D        # [D, FF]
R_W2 = R_W1 + D        # [FF, D]
R_WD = R_W2 + FF       # [D, EXPAND*D]  (lane-padded to 128)
R_LN = R_WD + D        # [8, D]    rows: bo, g1, be1, b2, g2, be2, 0, 0
R_B = R_LN + 8         # [8, 128]  rows: bqkv(3D), b1(FF), bd(E*D padded), 0...
W_ROWS = R_B + 8       # 208 rows -> 208*128*4 B ~= 104 KiB resident in VMEM


def decoder_expand_kernel(x_ref, neg_ref, w_ref, out_ref):
    """x_ref: [N, D] activations; neg_ref: [N, N] additive mask (0 / -1e9);
    w_ref: [W_ROWS, 128] packed weights; out_ref: [N, 128] (cols >= E*D are 0).
    """
    x = x_ref[...]                                     # [N, D]
    neg = neg_ref[...]                                 # [N, N]

    def dot(a, b):
        return jnp.dot(a, b, preferred_element_type=jnp.float32)

    ln = w_ref[R_LN:R_LN + 8, 0:D]                     # [8, D]
    bo, g1, be1 = ln[0:1], ln[1:2], ln[2:3]
    b2, g2, be2 = ln[3:4], ln[4:5], ln[5:6]
    bias = w_ref[R_B:R_B + 8, :]                       # [8, 128]

    # ---- fused Q/K/V projection over the flattened batch (lane-dense) ----
    qkv = dot(x, w_ref[R_WQKV:R_WQKV + D, :]) + bias[0:1, :]       # [N, 128]

    # ---- per-head scores (transpose-free), one stacked softmax ----
    scores = []
    for h in range(H):                                 # static unroll, H = 4
        qh = qkv[:, h * DK:(h + 1) * DK]               # [N, DK] (scale folded)
        kh = qkv[:, D + h * DK:D + (h + 1) * DK]       # [N, DK]
        scores.append(lax.dot_general(qh, kh, (((1,), (1,)), ((), ())),
                                      preferred_element_type=jnp.float32))
    sc = jnp.concatenate(scores, axis=0)               # [H*N, N]
    sc = sc + jnp.concatenate([neg] * H, axis=0)       # block-diag + pad mask
    sc = sc - jnp.max(sc, axis=-1, keepdims=True)
    p = jnp.exp(sc)
    p = p * pl.reciprocal(jnp.sum(p, axis=-1, keepdims=True), approx=True)

    # ---- P @ V accumulated straight into rows of wo (no head concat) ----
    a = jnp.zeros((N, D), jnp.float32)
    for h in range(H):
        ph = p[h * N:(h + 1) * N, :]                   # [N, N]
        vh = qkv[:, 2 * D + h * DK:2 * D + (h + 1) * DK]
        wo_h = w_ref[R_WO + h * DK:R_WO + (h + 1) * DK, 0:D]
        a = a + dot(dot(ph, vh), wo_h)
    a = a + bo                                         # [N, D]

    def layer_norm(z, g, beta):
        mu = jnp.mean(z, axis=-1, keepdims=True)
        var = jnp.mean((z - mu) ** 2, axis=-1, keepdims=True)
        return (z - mu) * lax.rsqrt(var + EPS) * g + beta

    # ---- add & norm 1; FFN; add & norm 2 (dropouts identity in eval) ----
    t = layer_norm(x + a, g1, be1)
    hdn = jnp.maximum(dot(t, w_ref[R_W1:R_W1 + D, 0:FF]) + bias[1:2, 0:FF], 0.0)
    z = dot(hdn, w_ref[R_W2:R_W2 + FF, 0:D]) + b2
    y = layer_norm(t + z, g2, be2)

    # ---- expand linear: lane-dense [N, 128] store (cols >= EXPAND*D are 0) --
    out_ref[...] = dot(y, w_ref[R_WD:R_WD + D, :]) + bias[2:3, :]


def prepare_params(params):
    """One-time packing of all weights/biases into a single [W_ROWS, 128] f32
    slab (a single DMA per forward).  The 1/sqrt(DK) attention scale is folded
    into wq/bq.  Call once and reuse across forward calls.
    (On v6e/v7x this slab could be bf16 with f32 accumulation in the kernel;
    kept f32 so the same kernel is also exact/safe on v5e.)"""
    f32 = jnp.float32
    scale = 1.0 / (DK ** 0.5)
    slab = jnp.zeros((W_ROWS, LANES), f32)
    wqkv = jnp.concatenate([params["wq"] * scale, params["wk"], params["wv"]], 1)
    bqkv = jnp.concatenate([params["bq"] * scale, params["bk"], params["bv"]], 1)
    slab = slab.at[R_WQKV:R_WQKV + D, 0:3 * D].set(wqkv.astype(f32))
    slab = slab.at[R_WO:R_WO + D, 0:D].set(params["wo"].astype(f32))
    slab = slab.at[R_W1:R_W1 + D, 0:FF].set(params["w1"].astype(f32))
    slab = slab.at[R_W2:R_W2 + FF, 0:D].set(params["w2"].astype(f32))
    slab = slab.at[R_WD:R_WD + D, 0:EXPAND * D].set(params["wd"].astype(f32))
    lnv = jnp.concatenate([params["bo"], params["g1"], params["be1"],
                           params["b2"], params["g2"], params["be2"]], 0)
    slab = slab.at[R_LN:R_LN + 6, 0:D].set(lnv.astype(f32))
    slab = slab.at[R_B, 0:3 * D].set(bqkv[0].astype(f32))
    slab = slab.at[R_B + 1, 0:FF].set(params["b1"][0].astype(f32))
    slab = slab.at[R_B + 2, 0:EXPAND * D].set(params["bd"][0].astype(f32))
    return slab


def build_additive_mask(mask):
    """mask [B, 1, S] or [B, S, S] (1 = attend, 0 = masked) -> [N, N]
    block-diagonal additive mask (0 attend, -1e9 masked / cross-batch).
    Cheap; hoist & reuse when the mask does not change between calls."""
    m = jnp.broadcast_to(mask.astype(jnp.float32).reshape(B, -1, S), (B, S, S))
    block = jnp.where(m != 0.0, 0.0, -1e9).astype(jnp.float32)     # [B, S, S]
    neg = jnp.full((N, N), -1e9, jnp.float32)
    for b in range(B):                                             # static, B=2
        neg = neg.at[b * S:(b + 1) * S, b * S:(b + 1) * S].set(block[b])
    return neg


def decoder_expand_layer(x, mask, w_slab):
    """x: [B, S, D] f32, mask: [B, 1, S] (or [B, S, S]) f32,
    w_slab: output of prepare_params.  Returns [B, S*EXPAND, D]."""
    x2 = x.reshape(N, D)
    neg = build_additive_mask(mask)
    # No grid: whole problem (<120 KiB) in one kernel invocation, whole arrays
    # resident in VMEM (default full-array BlockSpecs), exactly 3 input DMAs.
    out = pl.pallas_call(
        decoder_expand_kernel,
        out_shape=jax.ShapeDtypeStruct((N, LANES), jnp.float32),
    )(x2, neg, w_slab)
    # matches `self.linear(y).view(x.shape[0], -1, x.shape[-1])`
    return out[:, :EXPAND * D].reshape(B, S * EXPAND, D)


decoder_expand_forward = jax.jit(decoder_expand_layer)


def init_params(key):
    ks = jax.random.split(key, 12)
    scale = 0.05
    return {
        "wq": jax.random.normal(ks[0], (D, D), jnp.float32) * scale,
        "bq": jnp.zeros((1, D), jnp.float32),
        "wk": jax.random.normal(ks[1], (D, D), jnp.float32) * scale,
        "bk": jnp.zeros((1, D), jnp.float32),
        "wv": jax.random.normal(ks[2], (D, D), jnp.float32) * scale,
        "bv": jnp.zeros((1, D), jnp.float32),
        "wo": jax.random.normal(ks[3], (D, D), jnp.float32) * scale,
        "bo": jnp.zeros((1, D), jnp.float32),
        "g1": jnp.ones((1, D), jnp.float32),
        "be1": jnp.zeros((1, D), jnp.float32),
        "w1": jax.random.normal(ks[4], (D, FF), jnp.float32) * scale,
        "b1": jnp.zeros((1, FF), jnp.float32),
        "w2": jax.random.normal(ks[5], (FF, D), jnp.float32) * scale,
        "b2": jnp.zeros((1, D), jnp.float32),
        "g2": jnp.ones((1, D), jnp.float32),
        "be2": jnp.zeros((1, D), jnp.float32),
        "wd": jax.random.normal(ks[6], (D, EXPAND * D), jnp.float32) * scale,
        "bd": jnp.zeros((1, EXPAND * D), jnp.float32),
    }


def _reference(x, mask, params):
    """Pure-JAX mirror of the PyTorch module (eval mode) for validation."""
    scale = 1.0 / (DK ** 0.5)

    def ln_(z, g, b):
        mu = jnp.mean(z, -1, keepdims=True)
        var = jnp.mean((z - mu) ** 2, -1, keepdims=True)
        return (z - mu) / jnp.sqrt(var + EPS) * g + b

    q = x @ params["wq"] + params["bq"]
    k = x @ params["wk"] + params["bk"]
    v = x @ params["wv"] + params["bv"]
    split = lambda t: t.reshape(B, S, H, DK).transpose(0, 2, 1, 3)  # [B,H,S,DK]
    q, k, v = split(q), split(k), split(v)
    s = jnp.einsum("bhqd,bhkd->bhqk", q, k) * scale
    m = jnp.broadcast_to(mask.reshape(B, 1, -1, S), (B, H, S, S))
    s = jnp.where(m == 0.0, -1e9, s)
    p = jax.nn.softmax(s, axis=-1)
    o = jnp.einsum("bhqk,bhkd->bhqd", p, v).transpose(0, 2, 1, 3).reshape(B, S, D)
    a = o @ params["wo"] + params["bo"]
    t = ln_(x + a, params["g1"], params["be1"])
    z = jnp.maximum(t @ params["w1"] + params["b1"], 0.0) @ params["w2"] + params["b2"]
    y = ln_(t + z, params["g2"], params["be2"])
    y = y @ params["wd"] + params["bd"]
    return y.reshape(B, S * EXPAND, D)


if __name__ == "__main__":
    key = jax.random.PRNGKey(0)
    kx, kp = jax.random.split(key)
    x = jax.random.normal(kx, (B, S, D), jnp.float32)
    # mask: attend everywhere except the last 2 key positions of batch 1
    mask = jnp.ones((B, 1, S), jnp.float32)
    mask = mask.at[1, 0, -2:].set(0.0)
    params = init_params(kp)

    w_slab = prepare_params(params)           # hoisted one-time weight packing
    y = decoder_expand_forward(x, mask, w_slab)
    jax.block_until_ready(y)

    assert y.shape == (B, S * EXPAND, D), y.shape
    y_ref = _reference(x, mask, params)
    # approx reciprocal in the softmax denominator -> not bit-exact vs ref
    assert jnp.allclose(y, y_ref, atol=1e-2, rtol=1e-2), (
        float(jnp.max(jnp.abs(y - y_ref))))
    print("KERNEL_OK")
</pallas_src>

<mosaic_0001>
module attributes {stable_mosaic.version = 11 : i64} {
  func.func @decoder_expand_kernel(%arg0: memref<16x32xf32, #tpu.memory_space<vmem>>, %arg1: memref<16x16xf32, #tpu.memory_space<vmem>>, %arg2: memref<208x128xf32, #tpu.memory_space<vmem>>, %arg3: memref<16x128xf32, #tpu.memory_space<vmem>>) attributes {dimension_semantics = [], scalar_prefetch = 0 : i64, scratch_operands = 0 : i64, tpu.core_type = #tpu.core_type<tc>} {
    %c0 = arith.constant 0 : index
    %c0_0 = arith.constant 0 : index
    %0 = vector.load %arg0[%c0, %c0_0] : memref<16x32xf32, #tpu.memory_space<vmem>>, vector<16x32xf32>
    %c0_1 = arith.constant 0 : index
    %c0_2 = arith.constant 0 : index
    %1 = vector.load %arg1[%c0_1, %c0_2] : memref<16x16xf32, #tpu.memory_space<vmem>>, vector<16x16xf32>
    %c192 = arith.constant 192 : index
    %c0_3 = arith.constant 0 : index
    %2 = vector.load %arg2[%c192, %c0_3] : memref<208x128xf32, #tpu.memory_space<vmem>>, vector<8x32xf32>
    %3 = vector.extract_strided_slice %2 {offsets = [0, 0], sizes = [1, 32], strides = [1, 1]} : vector<8x32xf32> to vector<1x32xf32>
    %4 = vector.extract_strided_slice %2 {offsets = [1, 0], sizes = [1, 32], strides = [1, 1]} : vector<8x32xf32> to vector<1x32xf32>
    %5 = vector.extract_strided_slice %2 {offsets = [2, 0], sizes = [1, 32], strides = [1, 1]} : vector<8x32xf32> to vector<1x32xf32>
    %6 = vector.extract_strided_slice %2 {offsets = [3, 0], sizes = [1, 32], strides = [1, 1]} : vector<8x32xf32> to vector<1x32xf32>
    %7 = vector.extract_strided_slice %2 {offsets = [4, 0], sizes = [1, 32], strides = [1, 1]} : vector<8x32xf32> to vector<1x32xf32>
    %8 = vector.extract_strided_slice %2 {offsets = [5, 0], sizes = [1, 32], strides = [1, 1]} : vector<8x32xf32> to vector<1x32xf32>
    %c200 = arith.constant 200 : index
    %c0_4 = arith.constant 0 : index
    %9 = vector.load %arg2[%c200, %c0_4] : memref<208x128xf32, #tpu.memory_space<vmem>>, vector<8x128xf32>
    %c0_5 = arith.constant 0 : index
    %c0_6 = arith.constant 0 : index
    %10 = vector.load %arg2[%c0_5, %c0_6] : memref<208x128xf32, #tpu.memory_space<vmem>>, vector<32x128xf32>
    %cst = arith.constant dense<0.000000e+00> : vector<16x128xf32>
    %11 = tpu.matmul %0, %10, %cst {dimension_numbers = #tpu.dot_dimension_numbers<[1], [0], [0], [1], [0, 0, 1, 1], [], []>} : vector<16x32xf32>, vector<32x128xf32>, vector<16x128xf32> -> vector<16x128xf32>
    %12 = vector.extract_strided_slice %9 {offsets = [0, 0], sizes = [1, 128], strides = [1, 1]} : vector<8x128xf32> to vector<1x128xf32>
    %13 = vector.broadcast %12 : vector<1x128xf32> to vector<16x128xf32>
    %14 = arith.addf %11, %13 : vector<16x128xf32>
    %15 = vector.extract_strided_slice %14 {offsets = [0, 0], sizes = [16, 8], strides = [1, 1]} : vector<16x128xf32> to vector<16x8xf32>
    %16 = vector.extract_strided_slice %14 {offsets = [0, 32], sizes = [16, 8], strides = [1, 1]} : vector<16x128xf32> to vector<16x8xf32>
    %cst_7 = arith.constant dense<0.000000e+00> : vector<16x16xf32>
    %17 = tpu.matmul %15, %16, %cst_7 {dimension_numbers = #tpu.dot_dimension_numbers<[1], [1], [0], [0], [0, 0, 1, 0], [], []>} : vector<16x8xf32>, vector<16x8xf32>, vector<16x16xf32> -> vector<16x16xf32>
    %18 = vector.extract_strided_slice %14 {offsets = [0, 8], sizes = [16, 8], strides = [1, 1]} : vector<16x128xf32> to vector<16x8xf32>
    %19 = vector.extract_strided_slice %14 {offsets = [0, 40], sizes = [16, 8], strides = [1, 1]} : vector<16x128xf32> to vector<16x8xf32>
    %cst_8 = arith.constant dense<0.000000e+00> : vector<16x16xf32>
    %20 = tpu.matmul %18, %19, %cst_8 {dimension_numbers = #tpu.dot_dimension_numbers<[1], [1], [0], [0], [0, 0, 1, 0], [], []>} : vector<16x8xf32>, vector<16x8xf32>, vector<16x16xf32> -> vector<16x16xf32>
    %21 = vector.extract_strided_slice %14 {offsets = [0, 16], sizes = [16, 8], strides = [1, 1]} : vector<16x128xf32> to vector<16x8xf32>
    %22 = vector.extract_strided_slice %14 {offsets = [0, 48], sizes = [16, 8], strides = [1, 1]} : vector<16x128xf32> to vector<16x8xf32>
    %cst_9 = arith.constant dense<0.000000e+00> : vector<16x16xf32>
    %23 = tpu.matmul %21, %22, %cst_9 {dimension_numbers = #tpu.dot_dimension_numbers<[1], [1], [0], [0], [0, 0, 1, 0], [], []>} : vector<16x8xf32>, vector<16x8xf32>, vector<16x16xf32> -> vector<16x16xf32>
    %24 = vector.extract_strided_slice %14 {offsets = [0, 24], sizes = [16, 8], strides = [1, 1]} : vector<16x128xf32> to vector<16x8xf32>
    %25 = vector.extract_strided_slice %14 {offsets = [0, 56], sizes = [16, 8], strides = [1, 1]} : vector<16x128xf32> to vector<16x8xf32>
    %cst_10 = arith.constant dense<0.000000e+00> : vector<16x16xf32>
    %26 = tpu.matmul %24, %25, %cst_10 {dimension_numbers = #tpu.dot_dimension_numbers<[1], [1], [0], [0], [0, 0, 1, 0], [], []>} : vector<16x8xf32>, vector<16x8xf32>, vector<16x16xf32> -> vector<16x16xf32>
    %27 = tpu.concatenate %17, %20, %23, %26 in 0 : vector<16x16xf32>, vector<16x16xf32>, vector<16x16xf32>, vector<16x16xf32> -> vector<64x16xf32>
    %28 = tpu.concatenate %1, %1, %1, %1 in 0 : vector<16x16xf32>, vector<16x16xf32>, vector<16x16xf32>, vector<16x16xf32> -> vector<64x16xf32>
    %29 = arith.addf %27, %28 : vector<64x16xf32>
    %cst_11 = arith.constant dense<0xFF800000> : vector<64xf32>
    %30 = vector.multi_reduction <maximumf>, %29, %cst_11 [1] : vector<64x16xf32> to vector<64xf32>
    %31 = vector.shape_cast %30 : vector<64xf32> to vector<64x1xf32>
    %32 = vector.broadcast %31 : vector<64x1xf32> to vector<64x16xf32>
    %33 = arith.subf %29, %32 : vector<64x16xf32>
    %34 = math.exp %33 : vector<64x16xf32>
    %cst_12 = arith.constant dense<0.000000e+00> : vector<64xf32>
    %35 = vector.multi_reduction <add>, %34, %cst_12 [1] : vector<64x16xf32> to vector<64xf32>
    %36 = vector.shape_cast %35 : vector<64xf32> to vector<64x1xf32>
    %37 = tpu.reciprocal %36 {approx = true} : vector<64x1xf32> -> vector<64x1xf32>
    %38 = vector.broadcast %37 : vector<64x1xf32> to vector<64x16xf32>
    %39 = arith.mulf %34, %38 : vector<64x16xf32>
    %cst_13 = arith.constant 0.000000e+00 : f32
    %40 = vector.broadcast %cst_13 : f32 to vector<16x32xf32>
    %41 = vector.extract_strided_slice %39 {offsets = [0, 0], sizes = [16, 16], strides = [1, 1]} : vector<64x16xf32> to vector<16x16xf32>
    %42 = vector.extract_strided_slice %14 {offsets = [0, 64], sizes = [16, 8], strides = [1, 1]} : vector<16x128xf32> to vector<16x8xf32>
    %c32 = arith.constant 32 : index
    %c0_14 = arith.constant 0 : index
    %43 = vector.load %arg2[%c32, %c0_14] : memref<208x128xf32, #tpu.memory_space<vmem>>, vector<8x32xf32>
    %cst_15 = arith.constant dense<0.000000e+00> : vector<16x8xf32>
    %44 = tpu.matmul %41, %42, %cst_15 {dimension_numbers = #tpu.dot_dimension_numbers<[1], [0], [0], [1], [0, 0, 1, 1], [], []>} : vector<16x16xf32>, vector<16x8xf32>, vector<16x8xf32> -> vector<16x8xf32>
    %cst_16 = arith.constant dense<0.000000e+00> : vector<16x32xf32>
    %45 = tpu.matmul %44, %43, %cst_16 {dimension_numbers = #tpu.dot_dimension_numbers<[1], [0], [0], [1], [0, 0, 1, 1], [], []>} : vector<16x8xf32>, vector<8x32xf32>, vector<16x32xf32> -> vector<16x32xf32>
    %46 = arith.addf %40, %45 : vector<16x32xf32>
    %47 = vector.extract_strided_slice %39 {offsets = [16, 0], sizes = [16, 16], strides = [1, 1]} : vector<64x16xf32> to vector<16x16xf32>
    %48 = vector.extract_strided_slice %14 {offsets = [0, 72], sizes = [16, 8], strides = [1, 1]} : vector<16x128xf32> to vector<16x8xf32>
    %c40 = arith.constant 40 : index
    %c0_17 = arith.constant 0 : index
    %49 = vector.load %arg2[%c40, %c0_17] : memref<208x128xf32, #tpu.memory_space<vmem>>, vector<8x32xf32>
    %cst_18 = arith.constant dense<0.000000e+00> : vector<16x8xf32>
    %50 = tpu.matmul %47, %48, %cst_18 {dimension_numbers = #tpu.dot_dimension_numbers<[1], [0], [0], [1], [0, 0, 1, 1], [], []>} : vector<16x16xf32>, vector<16x8xf32>, vector<16x8xf32> -> vector<16x8xf32>
    %cst_19 = arith.constant dense<0.000000e+00> : vector<16x32xf32>
    %51 = tpu.matmul %50, %49, %cst_19 {dimension_numbers = #tpu.dot_dimension_numbers<[1], [0], [0], [1], [0, 0, 1, 1], [], []>} : vector<16x8xf32>, vector<8x32xf32>, vector<16x32xf32> -> vector<16x32xf32>
    %52 = arith.addf %46, %51 : vector<16x32xf32>
    %53 = vector.extract_strided_slice %39 {offsets = [32, 0], sizes = [16, 16], strides = [1, 1]} : vector<64x16xf32> to vector<16x16xf32>
    %54 = vector.extract_strided_slice %14 {offsets = [0, 80], sizes = [16, 8], strides = [1, 1]} : vector<16x128xf32> to vector<16x8xf32>
    %c48 = arith.constant 48 : index
    %c0_20 = arith.constant 0 : index
    %55 = vector.load %arg2[%c48, %c0_20] : memref<208x128xf32, #tpu.memory_space<vmem>>, vector<8x32xf32>
    %cst_21 = arith.constant dense<0.000000e+00> : vector<16x8xf32>
    %56 = tpu.matmul %53, %54, %cst_21 {dimension_numbers = #tpu.dot_dimension_numbers<[1], [0], [0], [1], [0, 0, 1, 1], [], []>} : vector<16x16xf32>, vector<16x8xf32>, vector<16x8xf32> -> vector<16x8xf32>
    %cst_22 = arith.constant dense<0.000000e+00> : vector<16x32xf32>
    %57 = tpu.matmul %56, %55, %cst_22 {dimension_numbers = #tpu.dot_dimension_numbers<[1], [0], [0], [1], [0, 0, 1, 1], [], []>} : vector<16x8xf32>, vector<8x32xf32>, vector<16x32xf32> -> vector<16x32xf32>
    %58 = arith.addf %52, %57 : vector<16x32xf32>
    %59 = vector.extract_strided_slice %39 {offsets = [48, 0], sizes = [16, 16], strides = [1, 1]} : vector<64x16xf32> to vector<16x16xf32>
    %60 = vector.extract_strided_slice %14 {offsets = [0, 88], sizes = [16, 8], strides = [1, 1]} : vector<16x128xf32> to vector<16x8xf32>
    %c56 = arith.constant 56 : index
    %c0_23 = arith.constant 0 : index
    %61 = vector.load %arg2[%c56, %c0_23] : memref<208x128xf32, #tpu.memory_space<vmem>>, vector<8x32xf32>
    %cst_24 = arith.constant dense<0.000000e+00> : vector<16x8xf32>
    %62 = tpu.matmul %59, %60, %cst_24 {dimension_numbers = #tpu.dot_dimension_numbers<[1], [0], [0], [1], [0, 0, 1, 1], [], []>} : vector<16x16xf32>, vector<16x8xf32>, vector<16x8xf32> -> vector<16x8xf32>
    %cst_25 = arith.constant dense<0.000000e+00> : vector<16x32xf32>
    %63 = tpu.matmul %62, %61, %cst_25 {dimension_numbers = #tpu.dot_dimension_numbers<[1], [0], [0], [1], [0, 0, 1, 1], [], []>} : vector<16x8xf32>, vector<8x32xf32>, vector<16x32xf32> -> vector<16x32xf32>
    %64 = arith.addf %58, %63 : vector<16x32xf32>
    %65 = vector.broadcast %3 : vector<1x32xf32> to vector<16x32xf32>
    %66 = arith.addf %64, %65 : vector<16x32xf32>
    %67 = arith.addf %0, %66 : vector<16x32xf32>
    %cst_26 = arith.constant dense<0.000000e+00> : vector<16xf32>
    %68 = vector.multi_reduction <add>, %67, %cst_26 [1] : vector<16x32xf32> to vector<16xf32>
    %69 = vector.shape_cast %68 : vector<16xf32> to vector<16x1xf32>
    %cst_27 = arith.constant 3.200000e+01 : f32
    %70 = vector.broadcast %cst_27 : f32 to vector<16x1xf32>
    %71 = arith.divf %69, %70 : vector<16x1xf32>
    %72 = vector.broadcast %71 : vector<16x1xf32> to vector<16x32xf32>
    %73 = arith.subf %67, %72 : vector<16x32xf32>
    %74 = arith.mulf %73, %73 : vector<16x32xf32>
    %cst_28 = arith.constant dense<0.000000e+00> : vector<16xf32>
    %75 = vector.multi_reduction <add>, %74, %cst_28 [1] : vector<16x32xf32> to vector<16xf32>
    %76 = vector.shape_cast %75 : vector<16xf32> to vector<16x1xf32>
    %cst_29 = arith.constant 3.200000e+01 : f32
    %77 = vector.broadcast %cst_29 : f32 to vector<16x1xf32>
    %78 = arith.divf %76, %77 : vector<16x1xf32>
    %79 = vector.broadcast %71 : vector<16x1xf32> to vector<16x32xf32>
    %80 = arith.subf %67, %79 : vector<16x32xf32>
    %cst_30 = arith.constant 9.99999997E-7 : f32
    %81 = vector.broadcast %cst_30 : f32 to vector<16x1xf32>
    %82 = arith.addf %78, %81 : vector<16x1xf32>
    %83 = math.rsqrt %82 : vector<16x1xf32>
    %84 = vector.broadcast %83 : vector<16x1xf32> to vector<16x32xf32>
    %85 = arith.mulf %80, %84 : vector<16x32xf32>
    %86 = vector.broadcast %4 : vector<1x32xf32> to vector<16x32xf32>
    %87 = arith.mulf %85, %86 : vector<16x32xf32>
    %88 = vector.broadcast %5 : vector<1x32xf32> to vector<16x32xf32>
    %89 = arith.addf %87, %88 : vector<16x32xf32>
    %c64 = arith.constant 64 : index
    %c0_31 = arith.constant 0 : index
    %90 = vector.load %arg2[%c64, %c0_31] : memref<208x128xf32, #tpu.memory_space<vmem>>, vector<32x64xf32>
    %cst_32 = arith.constant dense<0.000000e+00> : vector<16x64xf32>
    %91 = tpu.matmul %89, %90, %cst_32 {dimension_numbers = #tpu.dot_dimension_numbers<[1], [0], [0], [1], [0, 0, 1, 1], [], []>} : vector<16x32xf32>, vector<32x64xf32>, vector<16x64xf32> -> vector<16x64xf32>
    %92 = vector.extract_strided_slice %9 {offsets = [1, 0], sizes = [1, 64], strides = [1, 1]} : vector<8x128xf32> to vector<1x64xf32>
    %93 = vector.broadcast %92 : vector<1x64xf32> to vector<16x64xf32>
    %94 = arith.addf %91, %93 : vector<16x64xf32>
    %cst_33 = arith.constant 0.000000e+00 : f32
    %95 = vector.broadcast %cst_33 : f32 to vector<16x64xf32>
    %96 = arith.maximumf %94, %95 : vector<16x64xf32>
    %c96 = arith.constant 96 : index
    %c0_34 = arith.constant 0 : index
    %97 = vector.load %arg2[%c96, %c0_34] : memref<208x128xf32, #tpu.memory_space<vmem>>, vector<64x32xf32>
    %cst_35 = arith.constant dense<0.000000e+00> : vector<16x32xf32>
    %98 = tpu.matmul %96, %97, %cst_35 {dimension_numbers = #tpu.dot_dimension_numbers<[1], [0], [0], [1], [0, 0, 1, 1], [], []>} : vector<16x64xf32>, vector<64x32xf32>, vector<16x32xf32> -> vector<16x32xf32>
    %99 = vector.broadcast %6 : vector<1x32xf32> to vector<16x32xf32>
    %100 = arith.addf %98, %99 : vector<16x32xf32>
    %101 = arith.addf %89, %100 : vector<16x32xf32>
    %cst_36 = arith.constant dense<0.000000e+00> : vector<16xf32>
    %102 = vector.multi_reduction <add>, %101, %cst_36 [1] : vector<16x32xf32> to vector<16xf32>
    %103 = vector.shape_cast %102 : vector<16xf32> to vector<16x1xf32>
    %cst_37 = arith.constant 3.200000e+01 : f32
    %104 = vector.broadcast %cst_37 : f32 to vector<16x1xf32>
    %105 = arith.divf %103, %104 : vector<16x1xf32>
    %106 = vector.broadcast %105 : vector<16x1xf32> to vector<16x32xf32>
    %107 = arith.subf %101, %106 : vector<16x32xf32>
    %108 = arith.mulf %107, %107 : vector<16x32xf32>
    %cst_38 = arith.constant dense<0.000000e+00> : vector<16xf32>
    %109 = vector.multi_reduction <add>, %108, %cst_38 [1] : vector<16x32xf32> to vector<16xf32>
    %110 = vector.shape_cast %109 : vector<16xf32> to vector<16x1xf32>
    %cst_39 = arith.constant 3.200000e+01 : f32
    %111 = vector.broadcast %cst_39 : f32 to vector<16x1xf32>
    %112 = arith.divf %110, %111 : vector<16x1xf32>
    %113 = vector.broadcast %105 : vector<16x1xf32> to vector<16x32xf32>
    %114 = arith.subf %101, %113 : vector<16x32xf32>
    %cst_40 = arith.constant 9.99999997E-7 : f32
    %115 = vector.broadcast %cst_40 : f32 to vector<16x1xf32>
    %116 = arith.addf %112, %115 : vector<16x1xf32>
    %117 = math.rsqrt %116 : vector<16x1xf32>
    %118 = vector.broadcast %117 : vector<16x1xf32> to vector<16x32xf32>
    %119 = arith.mulf %114, %118 : vector<16x32xf32>
    %120 = vector.broadcast %7 : vector<1x32xf32> to vector<16x32xf32>
    %121 = arith.mulf %119, %120 : vector<16x32xf32>
    %122 = vector.broadcast %8 : vector<1x32xf32> to vector<16x32xf32>
    %123 = arith.addf %121, %122 : vector<16x32xf32>
    %c160 = arith.constant 160 : index
    %c0_41 = arith.constant 0 : index
    %124 = vector.load %arg2[%c160, %c0_41] : memref<208x128xf32, #tpu.memory_space<vmem>>, vector<32x128xf32>
    %cst_42 = arith.constant dense<0.000000e+00> : vector<16x128xf32>
    %125 = tpu.matmul %123, %124, %cst_42 {dimension_numbers = #tpu.dot_dimension_numbers<[1], [0], [0], [1], [0, 0, 1, 1], [], []>} : vector<16x32xf32>, vector<32x128xf32>, vector<16x128xf32> -> vector<16x128xf32>
    %126 = vector.extract_strided_slice %9 {offsets = [2, 0], sizes = [1, 128], strides = [1, 1]} : vector<8x128xf32> to vector<1x128xf32>
    %127 = vector.broadcast %126 : vector<1x128xf32> to vector<16x128xf32>
    %128 = arith.addf %125, %127 : vector<16x128xf32>
    %c0_43 = arith.constant 0 : index
    %c0_44 = arith.constant 0 : index
    %129 = vector.load %arg3[%c0_43, %c0_44] : memref<16x128xf32, #tpu.memory_space<vmem>>, vector<16x128xf32>
    tpu.vector_store %arg3[%c0_43, %c0_44], %128 {strides = array<i32>} : memref<16x128xf32, #tpu.memory_space<vmem>>, vector<16x128xf32>,
    return
  }
}

</mosaic_0001>

<bundles_post_ra>
// kernel: decoder_expand_layer.1
= control target key start
LH: loop header
LB: loop body
LE: loop exit
PB: predicated region body
PF: predicated region fallthrough
CT: control target
= control target key end

     0   :  { %8 = vsyncpa [#allocation3], 0  ;;  %s2076_s12 = smov [#allocation2]   ;;  %s2279_s0 = inlined_call_operand.vmem [shape: f32[16,32], index: 0, kind: input, shape index: {}]   ;;  %s2280_s1 = inlined_call_operand.vmem [shape: f32[16,16], index: 1, kind: input, shape index: {}]   ;;  %s2281_s2 = inlined_call_operand.hbm [shape: f32[208,128], index: 2, kind: input, shape index: {}]   ;;  %s2282_s3 = inlined_call_operand.vmem [shape: f32[16,128], index: 3, kind: output, shape index: {}]  }
   0x1   :  { %s18_s13 = sshll.u32 %s2076_s12, 4  ;;  %s2052_s16 = scalar_lea.hbm %s2281_s2, 3328  ;;  %s19_s13 = int_to_ptr.vmem [resolvable:$true] %s18_s13 }
   0x2   :  { %p2053_p0 = scmp.ne.s32.totalorder %s2281_s2, %s2052_s16  ;;  %p2056_p1 = scmp.lt.u32.totalorder %s2052_s16, %s2281_s2 }
   0x4   :  { %p2058_p2 = pnand %p2056_p1, %p2053_p0 }
   0x6   :  { %2061 = shalt.err (!%p2058_p2)
}
   0x7   :  { %s2062_s21 = scalar_lea.vmem %s19_s13, 3328  ;;  %p2067_p4 = scmp.lt.s32.totalorder %s19_s13, %s19_s13 }
   0x8   :  { %p2063_p3 = scmp.ne.s32.totalorder %s19_s13, %s2062_s21  ;;  %p2068_p5 = scmp.lt.s32.totalorder %s2062_s21, %s2062_s21 }
   0xa   :  { %p2069_p6 = por %p2068_p5, %p2067_p4 }
   0xc   :  { %p2070_p7 = pnand %p2069_p6, %p2063_p3 }
   0xe   :  { %2073 = shalt.err (!%p2070_p7)
}
   0xf   :  { %s2077_s22 = smov 128   ;;  %s2078_s23 = smov 8  }
  0x10   :  { %24 = dma.hbm_to_vmem [thread:$0]  %s2281_s2, 3328, %s19_s13, [#allocation3], %s2077_s22, %s2077_s22, %s2078_s23  }
  0x11   :  { %2074 = dma.done.wait [#allocation3], 3328  }
  0x12   :  { %2075 = vsyncadd [#allocation3], 4294963968  ;;  %vm42_vm0 = vcmask 261120   ;;  %v34_v0 = vld [vmem:[#allocation2] sm:$0xff]  ;;  %v35_v1 = vld [vmem:[#allocation2 + $0x8] sm:$0xff]  ;;  %v38_v8 = vlaneseq  ;;  %vm130_vm1 = vcmask 64512  }
  0x13   :  { %v36_v2 = vld [vmem:[#allocation2 + $0x10] sm:$0xff]  ;;  %v1872_v3 = vpack.c.bf16 %v35_v1, %v34_v0  ;;  %v37_v4 = vld [vmem:[#allocation2 + $0x18] sm:$0xff]  ;;  %v2125_v5 = vld [vmem:[%s2279_s0] sm:$0xff]  ;;  %s2080_s29 = smov 96   ;;  %s2081_s30 = smov 88   ;;  %vm495_vm3 = vcmask 130048  }
  0x14   :  { %v1876_v6 = vpack.c.bf16 %v37_v4, %v36_v2  ;;  %1752 = vmatprep.mubr.msk.f32.mxu0 %vm42_vm0, %v2125_v5  ;;  %v2132_v7 = vld [vmem:[%s2279_s0 + $0x8] sm:$0xff]  ;;  %v2136_v9 = vshrl.u32 %v38_v8, 7  ;;  %s2079_s0 = smov 120   ;;  %s2082_s4 = smov 72   ;;  %vm2154_vm2 = vmpackc.low %vm130_vm1, %vm130_vm1  ;;  %v30_v42 = vld [vmem:[%s2280_s1] sm:$0xff]  ;;  %vm1414_vm4 = vcmask 523264  }
  0x15   :  { %1873 = vmatprep.subr.bf16.mxu0 %v1872_v3  ;;  %v2139_v11 = vld [vmem:[#allocation2 + $0xc8] sm:$0xff]  ;;  %s2083_s5 = smov 80   ;;  %s2084_s6 = smov 112  }
  0x16   :  { %1875 = vmatpush3.bf16.msra.mxu0 %v1872_v3  ;;  %v40_v10 = vsub.s32 0, %v2136_v9  ;;  %s2085_s7 = smov 104   ;;  %v31_v41 = vld [vmem:[%s2280_s1 + $0x8] sm:$0xff]  ;;  %s2086_s1 = smov 64  }
  0x17   :  { %1877 = vmatprep.subr.bf16.mxu0 %v1876_v6  ;;  %s2087_s12 = smov 56   ;;  %s2088_s13 = smov 48  }
  0x18   :  { %v41_v12 = vrot.slane %v2139_v11, %v40_v10  ;;  %s2089_s14 = smov 40  }
  0x1a   :  { %1879 = vmatpush3.bf16.msra.mxu0 %v1876_v6 }
  0x1d   :  { %1753 = vmatmul.mubr.msk.f32.vlgmr.msra.gmra.mrb[0].mxu0 %vm42_vm0, %v2132_v7 }
  0xf0   :  { %v1754_v13 = vpop.f32.mrb[0].mxu0 }
  0xf1   :  { %v121_v14 = vadd.f32 %v1754_v13, %v41_v12  ;;  %v115_v15 = vpop.f32.mrb[1].mxu0 }
  0xf2   :  { %v116_v16 = vadd.f32 %v115_v15, %v41_v12 }
  0xf4   :  { %214 = vrot.lane.b32.xlu1 %v116_v16, %s2079_s0  ;;  %1759 = vmatprep.mubr.msk.f32.mxu1 %vm130_vm1, %v116_v16  ;;  %v2145_v17 = vpack.i.bf16 %v121_v14, %v116_v16 }
  0xf6   :  { %1973 = vrot.lane.b32.xlu0 %v2145_v17, %s2080_s29 }
  0xf8   :  { %216 = vrot.lane.b32.xlu1 %v121_v14, %s2079_s0 }
  0xfa   :  { %1978 = vrot.lane.b32.xlu0 %v2145_v17, %s2081_s30 }
  0xfc   :  { %1988 = vrot.lane.b32.xlu1 %v2145_v17, %s2082_s4 }
  0xfe   :  { %1983 = vrot.lane.b32.xlu0 %v2145_v17, %s2083_s5 }
 0x100   :  { %307 = vrot.lane.b32.xlu1 %v121_v14, %s2084_s6 }
 0x102   :  { %305 = vrot.lane.b32.xlu0 %v116_v16, %s2084_s6 }
 0x104   :  { %398 = vrot.lane.b32.xlu1 %v121_v14, %s2085_s7 }
 0x106   :  { %396 = vrot.lane.b32.xlu0 %v116_v16, %s2085_s7 }
 0x166   :  { %v215_v18 = vpop.permute.xlu1 %214 }
 0x167   :  { %1766 = vmatprep.mubr.msk.f32.mxu0 %vm130_vm1, %v215_v18 }
 0x168   :  { %v1974_v19 = vpop.permute.xlu0 %1973 }
 0x169   :  { %v1976_v20 = vunpack.i.h.bf16 %v1974_v19  ;;  %v1975_v21 = vunpack.i.l.bf16 %v1974_v19 }
 0x16a   :  { %v217_v22 = vpop.permute.xlu1 %216 }
 0x16b   :  { %v1880_v24 = vpack.c.bf16 %v1976_v20, %v1975_v21 }
 0x16c   :  { %v1979_v25 = vpop.permute.xlu0 %1978 }
 0x16d   :  { %v1981_v26 = vunpack.i.h.bf16 %v1979_v25  ;;  %v1980_v27 = vunpack.i.l.bf16 %v1979_v25  ;;  %1882 = vmatprep.subr.msk.bf16.mxu1 %vm2154_vm2, %v1880_v24 }
 0x16e   :  { %v1989_v28 = vpop.permute.xlu1 %1988  ;;  %1885 = vmatpush3.bf16.xpose.msk.msra.mxu1 %vm2154_vm2, %v1880_v24 }
 0x16f   :  { %v1886_v29 = vpack.c.bf16 %v1981_v26, %v1980_v27  ;;  %v1991_v30 = vunpack.i.h.bf16 %v1989_v28  ;;  %v1990_v31 = vunpack.i.l.bf16 %v1989_v28 }
 0x170   :  { %v1984_v32 = vpop.permute.xlu0 %1983 }
 0x171   :  { %v1898_v33 = vpack.c.bf16 %v1991_v30, %v1990_v31  ;;  %v1986_v34 = vunpack.i.h.bf16 %v1984_v32  ;;  %v1985_v35 = vunpack.i.l.bf16 %v1984_v32  ;;  %1888 = vmatprep.subr.msk.bf16.mxu0 %vm2154_vm2, %v1886_v29 }
 0x172   :  { %1891 = vmatpush3.bf16.xpose.msk.msra.mxu0 %vm2154_vm2, %v1886_v29  ;;  %v308_v39 = vpop.permute.xlu1 %307 }
 0x173   :  { %v1892_v36 = vpack.c.bf16 %v1986_v34, %v1985_v35  ;;  %1900 = vmatprep.subr.msk.bf16.mxu0 %vm2154_vm2, %v1898_v33 }
 0x174   :  { %v306_v37 = vpop.permute.xlu0 %305 }
 0x175   :  { %1760 = vmatmul.mubr.msk.f32.vlgmr.msra.gmra.mrb[0].mxu1 %vm130_vm1, %v121_v14  ;;  %1894 = vmatprep.subr.msk.bf16.mxu1 %vm2154_vm2, %v1892_v36 }
 0x176   :  { %1897 = vmatpush3.bf16.xpose.msk.msra.mxu1 %vm2154_vm2, %v1892_v36  ;;  %1773 = vmatprep.mubr.msk.f32.mxu1 %vm130_vm1, %v306_v37  ;;  %v399_v40 = vpop.permute.xlu1 %398 }
 0x178   :  { %v397_v38 = vpop.permute.xlu0 %396 }
 0x179   :  { %1767 = vmatmul.mubr.msk.f32.vlgmr.msra.gmra.mrb[2].mxu0 %vm130_vm1, %v217_v22 }
 0x17a   :  { %1903 = vmatpush3.bf16.xpose.msk.msra.mxu0 %vm2154_vm2, %v1898_v33  ;;  %1780 = vmatprep.mubr.msk.f32.mxu0 %vm130_vm1, %v397_v38 }
 0x17d   :  { %1774 = vmatmul.mubr.msk.f32.vlgmr.msra.gmra.mrb[2].mxu1 %vm130_vm1, %v308_v39 }
 0x181   :  { %1781 = vmatmul.mubr.msk.f32.vlgmr.msra.gmra.mrb[4].mxu0 %vm130_vm1, %v399_v40 }
 0x248   :  { %v1761_v43 = vpop.f32.mrb[0].mxu1 }
 0x249   :  { %v488_v44 = vadd.f32 %v1761_v43, %v31_v41  ;;  %v205_v45 = vpop.f32.mrb[1].mxu1 }
 0x24a   :  { %v487_v46 = vadd.f32 %v205_v45, %v30_v42 }
 0x24b   :  { %v499_v47 = vsel %vm495_vm3, %v488_v44, -inf }
 0x24c   :  { %v1768_v48 = vpop.f32.mrb[2].mxu0  ;;  %500 = vmax.xlane.f32.xlu1 %v499_v47  ;;  %v496_v49 = vsel %vm495_vm3, %v487_v46, -inf }
 0x24d   :  { %v296_v50 = vpop.f32.mrb[3].mxu0  ;;  %497 = vmax.xlane.f32.xlu0 %v496_v49  ;;  %v490_v52 = vadd.f32 %v1768_v48, %v31_v41 }
 0x24e   :  { %v489_v51 = vadd.f32 %v296_v50, %v30_v42 }
 0x24f   :  { %v505_v59 = vsel %vm495_vm3, %v490_v52, -inf }
 0x250   :  { %v1775_v53 = vpop.f32.mrb[2].mxu1  ;;  %v502_v54 = vsel %vm495_vm3, %v489_v51, -inf }
 0x251   :  { %v2189_v55 = vadd.f32 %v1775_v53, %v31_v41  ;;  %503 = vmax.xlane.f32.xlu0 %v502_v54  ;;  %v387_v56 = vpop.f32.mrb[3].mxu1 }
 0x252   :  { %v2191_v57 = vadd.f32 %v387_v56, %v30_v42 }
 0x253   :  { %v511_v26 = vsel %vm495_vm3, %v2189_v55, -inf }
 0x254   :  { %v1782_v58 = vpop.f32.mrb[4].mxu0  ;;  %v508_v25 = vsel %vm495_vm3, %v2191_v57, -inf }
 0x255   :  { %v2194_v60 = vadd.f32 %v1782_v58, %v31_v41  ;;  %v478_v61 = vpop.f32.mrb[5].mxu0  ;;  %506 = vmax.xlane.f32.xlu0 %v505_v59 }
 0x256   :  { %v2196_v62 = vadd.f32 %v478_v61, %v30_v42 }
 0x257   :  { %v517_v28 = vsel %vm495_vm3, %v2194_v60, -inf }
 0x258   :  { %v514_v27 = vsel %vm495_vm3, %v2196_v62, -inf }
 0x2d9   :  { %v501_v63 = vpop.xlane.xlu1 %500 }
 0x2da   :  { %v521_v0 = vsub.f32 %v488_v44, %v501_v63  ;;  %v498_v1 = vpop.xlane.xlu0 %497 }
 0x2db   :  { %v520_v2 = vsub.f32 %v487_v46, %v498_v1 }
 0x2dc   :  { %v530_v3 = vmul.f32 1.442695, %v521_v0 }
 0x2dd   :  { %v528_v4 = vmul.f32 1.442695, %v520_v2 }
 0x2de   :  { %2012 = vpow2.f32 %v530_v3  ;;  %v504_v6 = vpop.xlane.xlu0 %503 }
 0x2df   :  { %2014 = vpow2.f32 %v528_v4  ;;  %v522_v8 = vsub.f32 %v489_v51, %v504_v6 }
 0x2e1   :  { %v532_v12 = vmul.f32 1.442695, %v522_v8  ;;  %v584_v8 = vld [vmem:[#allocation2 + $0x20] sm:$0xff] }
 0x2e2   :  { %v507_v13 = vpop.xlane.xlu0 %506  ;;  %1802 = vmatprep.subr.mxu0 %v584_v8 }
 0x2e3   :  { %2016 = vpow2.f32 %v532_v12  ;;  %v523_v14 = vsub.f32 %v490_v52, %v507_v13  ;;  %1803 = vmatpush3.msra.mxu0 %v584_v8  ;;  %v922_v12 = vld [vmem:[#allocation2 + $0x30] sm:$0xff]  ;;  %v1403_v8 = vld [vmem:[#allocation2 + $0x68] sm:$0xff] }
 0x2e4   :  { %1814 = vmatprep.subr.mxu0 %v922_v12 }
 0x2e5   :  { %v534_v15 = vmul.f32 1.442695, %v523_v14 }
 0x2e7   :  { %2018 = vpow2.f32 %v534_v15 }
 0x2e8   :  { %v2013_v16 = vpop.eup %2012 }
 0x2e9   :  { %v2015_v18 = vpop.eup %2014  ;;  %v547_v19 = vsel %vm495_vm3, %v2013_v16, 0.0 }
 0x2ea   :  { %548 = vadd.xlane.f32.xlu0 %v547_v19  ;;  %v544_v20 = vsel %vm495_vm3, %v2015_v18, 0.0 }
 0x2eb   :  { %545 = vadd.xlane.f32.xlu1 %v544_v20 }
 0x2ed   :  { %v2017_v21 = vpop.eup %2016 }
 0x2ee   :  { %v550_v22 = vsel %vm495_vm3, %v2017_v21, 0.0 }
 0x2ef   :  { %551 = vadd.xlane.f32.xlu1 %v550_v22 }
 0x2f1   :  { %v2019_v23 = vpop.eup %2018 }
 0x2f2   :  { %v553_v24 = vsel %vm495_vm3, %v2019_v23, 0.0 }
 0x2f3   :  { %554 = vadd.xlane.f32.xlu0 %v553_v24 }
 0x300   :  { %1993 = vrot.lane.b32.xlu1 %v2145_v17, %s2086_s1 }
 0x309   :  { %1998 = vrot.lane.b32.xlu0 %v2145_v17, %s2087_s12 }
 0x324   :  { %509 = vmax.xlane.f32.xlu1 %v508_v25 }
 0x328   :  { %512 = vmax.xlane.f32.xlu0 %v511_v26  ;;  %515 = vmax.xlane.f32.xlu1 %v514_v27 }
 0x32c   :  { %518 = vmax.xlane.f32.xlu0 %v517_v28 }
 0x377   :  { %v549_v29 = vpop.xlane.xlu0 %548 }
 0x378   :  { %v546_v30 = vpop.xlane.xlu1 %545 }
 0x379   :  { %2020 = vrcp.f32 %v546_v30 }
 0x37a   :  { %2022 = vrcp.f32 %v549_v29 }
 0x37c   :  { %v552_v31 = vpop.xlane.xlu1 %551 }
 0x37d   :  { %2024 = vrcp.f32 %v552_v31 }
 0x380   :  { %v1994_v32 = vpop.permute.xlu1 %1993  ;;  %v555_v33 = vpop.xlane.xlu0 %554 }
 0x381   :  { %v1996_v34 = vunpack.i.h.bf16 %v1994_v32  ;;  %v1995_v35 = vunpack.i.l.bf16 %v1994_v32  ;;  %2026 = vrcp.f32 %v555_v33 }
 0x383   :  { %v2021_v36 = vpop.eup %2020  ;;  %v1904_v37 = vpack.c.bf16 %v1996_v34, %v1995_v35 }
 0x384   :  { %v2023_v38 = vpop.eup %2022  ;;  %v1999_v39 = vpop.permute.xlu0 %1998  ;;  %v576_v40 = vmul.f32 %v2021_v36, %v2015_v18 }
 0x385   :  { %v2001_v41 = vunpack.i.h.bf16 %v1999_v39  ;;  %v2000_v42 = vunpack.i.l.bf16 %v1999_v39  ;;  %1905 = vmatprep.subr.bf16.mxu1 %v1904_v37  ;;  %v577_v44 = vmul.f32 %v2023_v38, %v2013_v16 }
 0x386   :  { %1907 = vmatpush3.bf16.msra.mxu1 %v1904_v37  ;;  %1787 = vmatprep.mubr.msk.f32.mxu1 %vm495_vm3, %v576_v40  ;;  %v1093_v37 = vld [vmem:[#allocation2 + $0x38] sm:$0xff] }
 0x387   :  { %v2025_v43 = vpop.eup %2024  ;;  %v1908_v45 = vpack.c.bf16 %v2001_v41, %v2000_v42 }
 0x388   :  { %v578_v46 = vmul.f32 %v2025_v43, %v2017_v21 }
 0x389   :  { %1788 = vmatmul.mubr.msk.f32.vlgmr.msra.gmra.mrb[4].mxu1 %vm495_vm3, %v577_v44  ;;  %1909 = vmatprep.subr.bf16.mxu1 %v1908_v45  ;;  %v2238_v44 = vld [vmem:[#allocation2 + $0xc0] sm:$0xff] }
 0x38a   :  { %1911 = vmatpush3.bf16.msra.mxu1 %v1908_v45  ;;  %1794 = vmatprep.mubr.msk.f32.mxu1 %vm495_vm3, %v578_v46  ;;  %v1267_v45 = vrot.slane %v2238_v44, %v40_v10 }
 0x38b   :  { %v2027_v47 = vpop.eup %2026 }
 0x38c   :  { %v579_v48 = vmul.f32 %v2027_v47, %v2019_v23 }
 0x38e   :  { %1795 = vmatmul.mubr.msk.f32.vlgmr.msra.gmra.mrb[6].mxu1 %vm495_vm3, %v579_v48 }
 0x3b1   :  { %v510_v49 = vpop.xlane.xlu1 %509 }
 0x3b2   :  { %v524_v50 = vsub.f32 %v2191_v57, %v510_v49 }
 0x3b4   :  { %v536_v51 = vmul.f32 1.442695, %v524_v50 }
 0x3b5   :  { %v513_v52 = vpop.xlane.xlu0 %512  ;;  %v516_v53 = vpop.xlane.xlu1 %515 }
 0x3b6   :  { %2028 = vpow2.f32 %v536_v51  ;;  %v525_v54 = vsub.f32 %v2189_v55, %v513_v52  ;;  %v526_v56 = vsub.f32 %v2196_v62, %v516_v53 }
 0x3b8   :  { %v538_v58 = vmul.f32 1.442695, %v525_v54  ;;  %v540_v59 = vmul.f32 1.442695, %v526_v56 }
 0x3b9   :  { %v519_v61 = vpop.xlane.xlu0 %518 }
 0x3ba   :  { %2030 = vpow2.f32 %v538_v58  ;;  %v527_v63 = vsub.f32 %v2194_v60, %v519_v61  ;;  %v672_v60 = vld [vmem:[#allocation2 + $0x28] sm:$0xff] }
 0x3bb   :  { %2032 = vpow2.f32 %v540_v59  ;;  %1797 = vmatprep.subr.mxu1 %v672_v60 }
 0x3bc   :  { %v542_v0 = vmul.f32 1.442695, %v527_v63  ;;  %1798 = vmatpush3.msra.mxu1 %v672_v60  ;;  %v1402_v60 = vld [vmem:[#allocation2 + $0x60] sm:$0xff] }
 0x3be   :  { %2034 = vpow2.f32 %v542_v0 }
 0x3c0   :  { %v2029_v1 = vpop.eup %2028 }
 0x3c1   :  { %v556_v57 = vsel %vm495_vm3, %v2029_v1, 0.0 }
 0x3c2   :  { %557 = vadd.xlane.f32.xlu1 %v556_v57 }
 0x3c4   :  { %v2031_v2 = vpop.eup %2030 }
 0x3c5   :  { %v2033_v3 = vpop.eup %2032  ;;  %v559_v4 = vsel %vm495_vm3, %v2031_v2, 0.0 }
 0x3c6   :  { %560 = vadd.xlane.f32.xlu0 %v559_v4  ;;  %v562_v55 = vsel %vm495_vm3, %v2033_v3, 0.0 }
 0x3c7   :  { %563 = vadd.xlane.f32.xlu1 %v562_v55  ;;  %v1313_v55 = vld [vmem:[#allocation2 + $0x50] sm:$0xff] }
 0x3c8   :  { %v2035_v62 = vpop.eup %2034 }
 0x3c9   :  { %v565_v6 = vsel %vm495_vm3, %v2035_v62, 0.0 }
 0x3ca   :  { %566 = vadd.xlane.f32.xlu0 %v565_v6 }
 0x3d8   :  { %2003 = vrot.lane.b32.xlu1 %v2145_v17, %s2088_s13 }
 0x3e0   :  { %2008 = vrot.lane.b32.xlu0 %v2145_v17, %s2089_s14 }
 0x44f   :  { %v558_v13 = vpop.xlane.xlu1 %557 }
 0x450   :  { %2036 = vrcp.f32 %v558_v13  ;;  %v1928_v13 = vpack.c.bf16 %v1403_v8, %v1402_v60  ;;  %v1539_v60 = vld [vmem:[#allocation2 + $0xb8] sm:$0xff] }
 0x453   :  { %v561_v14 = vpop.xlane.xlu0 %560 }
 0x454   :  { %v564_v15 = vpop.xlane.xlu1 %563  ;;  %2038 = vrcp.f32 %v561_v14  ;;  %v1405_v14 = vld [vmem:[#allocation2 + $0x78] sm:$0xff] }
 0x455   :  { %2040 = vrcp.f32 %v564_v15 }
 0x457   :  { %v567_v16 = vpop.xlane.xlu0 %566 }
 0x458   :  { %v2004_v18 = vpop.permute.xlu1 %2003  ;;  %2042 = vrcp.f32 %v567_v16  ;;  %v1406_v16 = vld [vmem:[#allocation2 + $0x80] sm:$0xff] }
 0x459   :  { %v2006_v19 = vunpack.i.h.bf16 %v2004_v18  ;;  %v2005_v20 = vunpack.i.l.bf16 %v2004_v18  ;;  %v1407_v18 = vld [vmem:[#allocation2 + $0x88] sm:$0xff] }
 0x45a   :  { %v2037_v17 = vpop.eup %2036 }
 0x45b   :  { %v1912_v21 = vpack.c.bf16 %v2006_v19, %v2005_v20  ;;  %v2009_v23 = vpop.permute.xlu0 %2008  ;;  %v580_v30 = vmul.f32 %v2037_v17, %v2029_v1  ;;  %v1936_v19 = vpack.c.bf16 %v1407_v18, %v1406_v16 }
 0x45c   :  { %v1789_v22 = vpop.f32.mrb[4].mxu1  ;;  %v2011_v25 = vunpack.i.h.bf16 %v2009_v23  ;;  %v2010_v26 = vunpack.i.l.bf16 %v2009_v23 }
 0x45d   :  { %1913 = vmatprep.subr.bf16.mxu1 %v1912_v21  ;;  %v663_v24 = vpop.f32.mrb[5].mxu1 }
 0x45e   :  { %1804 = vmatprep.mubr.msk.f32.mxu0 %vm130_vm1, %v663_v24  ;;  %v2039_v29 = vpop.eup %2038  ;;  %v1916_v32 = vpack.c.bf16 %v2011_v25, %v2010_v26  ;;  %v1301_v25 = vsub.s32 1, %v2136_v9  ;;  %v1307_v26 = vsub.s32 2, %v2136_v9 }
 0x45f   :  { %1805 = vmatmul.mubr.msk.f32.vlgmr.msra.gmra.mrb[6].mxu0 %vm130_vm1, %v1789_v22  ;;  %v2041_v31 = vpop.eup %2040  ;;  %v581_v33 = vmul.f32 %v2039_v29, %v2031_v2 }
 0x460   :  { %1815 = vmatpush3.msra.mxu0 %v922_v12  ;;  %v582_v35 = vmul.f32 %v2041_v31, %v2033_v3  ;;  %v1312_v3 = vld [vmem:[#allocation2 + $0x48] sm:$0xff]  ;;  %v1404_v12 = vld [vmem:[#allocation2 + $0x70] sm:$0xff] }
 0x461   :  { %v1796_v27 = vpop.f32.mrb[6].mxu1  ;;  %1826 = vmatprep.subr.mxu0 %v1093_v37  ;;  %v1932_v15 = vpack.c.bf16 %v1405_v14, %v1404_v12 }
 0x462   :  { %v751_v28 = vpop.f32.mrb[7].mxu1  ;;  %v2043_v34 = vpop.eup %2042 }
 0x463   :  { %1799 = vmatprep.mubr.msk.f32.mxu1 %vm130_vm1, %v751_v28  ;;  %v583_v36 = vmul.f32 %v2043_v34, %v2035_v62  ;;  %v1314_v62 = vld [vmem:[#allocation2 + $0x58] sm:$0xff] }
 0x464   :  { %1800 = vmatmul.mubr.msk.f32.vlgmr.msra.gmra.mrb[8].mxu1 %vm130_vm1, %v1796_v27  ;;  %v1924_v6 = vpack.c.bf16 %v1314_v62, %v1313_v55  ;;  %v1302_v27 = vrot.slane %v2238_v44, %v1301_v25  ;;  %v1537_v55 = vld [vmem:[#allocation2 + $0xa8] sm:$0xff] }
 0x465   :  { %1915 = vmatpush3.bf16.msra.mxu1 %v1912_v21  ;;  %1811 = vmatprep.mubr.msk.f32.mxu1 %vm495_vm3, %v580_v30 }
 0x466   :  { %1917 = vmatprep.subr.bf16.mxu1 %v1916_v32 }
 0x468   :  { %1812 = vmatmul.mubr.msk.f32.vlgmr.msra.gmra.mrb[10].mxu1 %vm495_vm3, %v581_v33 }
 0x469   :  { %1919 = vmatpush3.bf16.msra.mxu1 %v1916_v32  ;;  %1823 = vmatprep.mubr.msk.f32.mxu1 %vm495_vm3, %v582_v35  ;;  %v1308_v32 = vrot.slane %v2238_v44, %v1307_v26 }
 0x46c   :  { %1824 = vmatmul.mubr.msk.f32.vlgmr.msra.gmra.mrb[12].mxu1 %vm495_vm3, %v583_v36 }
 0x537   :  { %v1801_v38 = vpop.f32.mrb[8].mxu1 }
 0x538   :  { %v832_v39 = vpop.f32.mrb[9].mxu1 }
 0x53b   :  { %v1813_v40 = vpop.f32.mrb[10].mxu1 }
 0x53c   :  { %v1001_v41 = vpop.f32.mrb[11].mxu1 }
 0x53d   :  { %1816 = vmatprep.mubr.msk.f32.mxu0 %vm130_vm1, %v1001_v41 }
 0x53e   :  { %1817 = vmatmul.mubr.msk.f32.vlgmr.msra.gmra.mrb[6].mxu0 %vm130_vm1, %v1813_v40  ;;  %v1318_v40 = vrot.slane %v2139_v11, %v1301_v25 }
 0x53f   :  { %1827 = vmatpush3.msra.mxu0 %v1093_v37  ;;  %v1825_v42 = vpop.f32.mrb[12].mxu1  ;;  %v1408_v37 = vld [vmem:[#allocation2 + $0x90] sm:$0xff] }
 0x540   :  { %v1172_v43 = vpop.f32.mrb[13].mxu1  ;;  %1929 = vmatprep.subr.bf16.mxu0 %v1928_v13 }
 0x541   :  { %1828 = vmatprep.mubr.msk.f32.mxu0 %vm130_vm1, %v1172_v43 }
 0x546   :  { %1829 = vmatmul.mubr.msk.f32.vlgmr.msra.gmra.mrb[6].mxu0 %vm130_vm1, %v1825_v42 }
 0x547   :  { %1931 = vmatpush3.bf16.msra.mxu0 %v1928_v13 }
 0x548   :  { %1933 = vmatprep.subr.bf16.mxu0 %v1932_v15 }
 0x54b   :  { %1935 = vmatpush3.bf16.msra.mxu0 %v1932_v15 }
 0x54c   :  { %1937 = vmatprep.subr.bf16.mxu0 %v1936_v19 }
 0x54f   :  { %1939 = vmatpush3.bf16.msra.mxu0 %v1936_v19  ;;  %v1526_v19 = vsub.s32 4, %v2136_v9 }
 0x619   :  { %v1830_v46 = vpop.f32.mrb[6].mxu0 }
 0x61a   :  { %v1952_v47 = vadd.f32 %v1830_v46, %v1801_v38  ;;  %v1253_v48 = vpop.f32.mrb[7].mxu0  ;;  %v1409_v38 = vld [vmem:[#allocation2 + $0x98] sm:$0xff] }
 0x61b   :  { %v1953_v49 = vadd.f32 %v1253_v48, %v832_v39  ;;  %v1940_v39 = vpack.c.bf16 %v1409_v38, %v1408_v37  ;;  %v1412_v48 = vsub.s32 3, %v2136_v9 }
 0x61c   :  { %v1269_v50 = vadd.f32 %v1952_v47, %v1267_v45 }
 0x61d   :  { %v1268_v51 = vadd.f32 %v1953_v49, %v1267_v45  ;;  %1941 = vmatprep.subr.bf16.mxu0 %v1940_v39  ;;  %v1413_v49 = vrot.slane %v2238_v44, %v1412_v48 }
 0x61e   :  { %v1271_v52 = vadd.f32 %v1269_v50, %v2132_v7  ;;  %1943 = vmatpush3.bf16.msra.mxu0 %v1940_v39 }
 0x61f   :  { %v1270_v53 = vadd.f32 %v1268_v51, %v2125_v5  ;;  %v1311_v5 = vld [vmem:[#allocation2 + $0x40] sm:$0xff] }
 0x620   :  { %v1275_v54 = vsel %vm42_vm0, %v1271_v52, 0.0  ;;  %v1920_v4 = vpack.c.bf16 %v1312_v3, %v1311_v5 }
 0x621   :  { %1276 = vadd.xlane.f32.xlu0 %v1275_v54  ;;  %v1272_v56 = vsel %vm42_vm0, %v1270_v53, 0.0 }
 0x622   :  { %1273 = vadd.xlane.f32.xlu1 %v1272_v56  ;;  %1921 = vmatprep.subr.bf16.mxu1 %v1920_v4 }
 0x623   :  { %1923 = vmatpush3.bf16.msra.mxu1 %v1920_v4  ;;  %v1536_v4 = vld [vmem:[#allocation2 + $0xa0] sm:$0xff] }
 0x624   :  { %1925 = vmatprep.subr.bf16.mxu1 %v1924_v6  ;;  %v1944_v62 = vpack.c.bf16 %v1537_v55, %v1536_v4 }
 0x627   :  { %1927 = vmatpush3.bf16.msra.mxu1 %v1924_v6  ;;  %v1538_v6 = vld [vmem:[#allocation2 + $0xb0] sm:$0xff] }
 0x628   :  { %v1948_v8 = vpack.c.bf16 %v1539_v60, %v1538_v6  ;;  %1945 = vmatprep.subr.bf16.mxu1 %v1944_v62 }
 0x6ae   :  { %v1277_v58 = vpop.xlane.xlu0 %1276 }
 0x6af   :  { %v1280_v59 = vmul.f32 0.03125, %v1277_v58  ;;  %v1274_v61 = vpop.xlane.xlu1 %1273 }
 0x6b0   :  { %v1279_v10 = vmul.f32 0.03125, %v1274_v61 }
 0x6b1   :  { %v1282_v63 = vsub.f32 %v1271_v52, %v1280_v59 }
 0x6b2   :  { %v1281_v0 = vsub.f32 %v1270_v53, %v1279_v10 }
 0x6b3   :  { %v1284_v1 = vmul.f32 %v1282_v63, %v1282_v63 }
 0x6b4   :  { %v1283_v57 = vmul.f32 %v1281_v0, %v1281_v0 }
 0x6b5   :  { %v1288_v2 = vsel %vm42_vm0, %v1284_v1, 0.0 }
 0x6b6   :  { %1289 = vadd.xlane.f32.xlu0 %v1288_v2  ;;  %v1285_v7 = vsel %vm42_vm0, %v1283_v57, 0.0 }
 0x6b7   :  { %1286 = vadd.xlane.f32.xlu1 %v1285_v7 }
 0x743   :  { %v1290_v20 = vpop.xlane.xlu0 %1289 }
 0x744   :  { %v1292_v21 = vmul.f32 0.03125, %v1290_v20  ;;  %v1287_v22 = vpop.xlane.xlu1 %1286  ;;  %v1532_v20 = vsub.s32 5, %v2136_v9 }
 0x745   :  { %v1291_v23 = vmul.f32 0.03125, %v1287_v22 }
 0x746   :  { %v1294_v24 = vadd.f32 1e-06, %v1292_v21  ;;  %v1527_v21 = vrot.slane %v2238_v44, %v1526_v19  ;;  %v1533_v25 = vrot.slane %v2238_v44, %v1532_v20 }
 0x747   :  { %v1293_v17 = vadd.f32 1e-06, %v1291_v23 }
 0x748   :  { %2044 = vrsqrt.f32 %v1294_v24 }
 0x749   :  { %2046 = vrsqrt.f32 %v1293_v17 }
 0x752   :  { %v2045_v28 = vpop.eup %2044 }
 0x753   :  { %v2047_v29 = vpop.eup %2046  ;;  %v1298_v30 = vmul.f32 %v2045_v28, %v1282_v63 }
 0x754   :  { %v1297_v31 = vmul.f32 %v2047_v29, %v1281_v0 }
 0x755   :  { %v1304_v33 = vmul.f32 %v1302_v27, %v1298_v30 }
 0x756   :  { %v1303_v34 = vmul.f32 %v1302_v27, %v1297_v31  ;;  %v1543_v31 = vrot.slane %v2139_v11, %v1307_v26 }
 0x757   :  { %v1310_v36 = vadd.f32 %v1308_v32, %v1304_v33 }
 0x758   :  { %v1309_v35 = vadd.f32 %v1308_v32, %v1303_v34 }
 0x75a   :  { %1839 = vmatprep.mubr.msk.f32.mxu1 %vm42_vm0, %v1309_v35 }
 0x75b   :  { %1840 = vmatmul.mubr.msk.f32.vlgmr.msra.gmra.mrb[14].mxu1 %vm42_vm0, %v1310_v36 }
 0x75c   :  { %1947 = vmatpush3.bf16.msra.mxu1 %v1944_v62 }
 0x75d   :  { %1949 = vmatprep.subr.bf16.mxu1 %v1948_v8 }
 0x760   :  { %1951 = vmatpush3.bf16.msra.mxu1 %v1948_v8 }
 0x82e   :  { %v1841_v41 = vpop.f32.mrb[14].mxu1 }
 0x82f   :  { %v1397_v42 = vadd.f32 %v1841_v41, %v1318_v40  ;;  %v1391_v43 = vpop.f32.mrb[15].mxu1 }
 0x830   :  { %v1392_v45 = vadd.f32 %v1391_v43, %v1318_v40 }
 0x831   :  { %v1401_v47 = vmax.f32 %v1397_v42, 0.0 }
 0x832   :  { %v1400_v46 = vmax.f32 %v1392_v45, 0.0 }
 0x834   :  { %1858 = vmatprep.mubr.msk.f32.mxu0 %vm1414_vm4, %v1400_v46 }
 0x835   :  { %1859 = vmatmul.mubr.msk.f32.vlgmr.msra.gmra.mrb[8].mxu0 %vm1414_vm4, %v1401_v47 }
 0x908   :  { %v1860_v50 = vpop.f32.mrb[8].mxu0 }
 0x909   :  { %v1493_v51 = vadd.f32 %v1860_v50, %v1413_v49  ;;  %v1487_v52 = vpop.f32.mrb[9].mxu0 }
 0x90a   :  { %v1488_v53 = vadd.f32 %v1487_v52, %v1413_v49 }
 0x90b   :  { %v1497_v54 = vadd.f32 %v1493_v51, %v1310_v36 }
 0x90c   :  { %v1496_v56 = vadd.f32 %v1488_v53, %v1309_v35 }
 0x90d   :  { %v1501_v58 = vsel %vm42_vm0, %v1497_v54, 0.0 }
 0x90e   :  { %1502 = vadd.xlane.f32.xlu0 %v1501_v58  ;;  %v1498_v59 = vsel %vm42_vm0, %v1496_v56, 0.0 }
 0x90f   :  { %1499 = vadd.xlane.f32.xlu1 %v1498_v59 }
 0x99b   :  { %v1503_v61 = vpop.xlane.xlu0 %1502 }
 0x99c   :  { %v1505_v10 = vmul.f32 0.03125, %v1503_v61  ;;  %v1500_v63 = vpop.xlane.xlu1 %1499 }
 0x99d   :  { %v1504_v0 = vmul.f32 0.03125, %v1500_v63 }
 0x99e   :  { %v1507_v1 = vsub.f32 %v1497_v54, %v1505_v10 }
 0x99f   :  { %v1506_v57 = vsub.f32 %v1496_v56, %v1504_v0 }
 0x9a0   :  { %v1509_v2 = vmul.f32 %v1507_v1, %v1507_v1 }
 0x9a1   :  { %v1508_v7 = vmul.f32 %v1506_v57, %v1506_v57 }
 0x9a2   :  { %v1513_v5 = vsel %vm42_vm0, %v1509_v2, 0.0 }
 0x9a3   :  { %1514 = vadd.xlane.f32.xlu0 %v1513_v5  ;;  %v1510_v3 = vsel %vm42_vm0, %v1508_v7, 0.0 }
 0x9a4   :  { %1511 = vadd.xlane.f32.xlu1 %v1510_v3 }
 0xa30   :  { %v1515_v12 = vpop.xlane.xlu0 %1514 }
 0xa31   :  { %v1517_v13 = vmul.f32 0.03125, %v1515_v12  ;;  %v1512_v14 = vpop.xlane.xlu1 %1511 }
 0xa32   :  { %v1516_v15 = vmul.f32 0.03125, %v1512_v14 }
 0xa33   :  { %v1519_v16 = vadd.f32 1e-06, %v1517_v13 }
 0xa34   :  { %v1518_v18 = vadd.f32 1e-06, %v1516_v15 }
 0xa35   :  { %2048 = vrsqrt.f32 %v1519_v16 }
 0xa36   :  { %2050 = vrsqrt.f32 %v1518_v18 }
 0xa3f   :  { %v2049_v22 = vpop.eup %2048 }
 0xa40   :  { %v2051_v23 = vpop.eup %2050  ;;  %v1523_v24 = vmul.f32 %v2049_v22, %v1507_v1 }
 0xa41   :  { %v1522_v17 = vmul.f32 %v2051_v23, %v1506_v57 }
 0xa42   :  { %v1529_v27 = vmul.f32 %v1527_v21, %v1523_v24 }
 0xa43   :  { %v1528_v28 = vmul.f32 %v1527_v21, %v1522_v17 }
 0xa44   :  { %v1535_v30 = vadd.f32 %v1533_v25, %v1529_v27 }
 0xa45   :  { %v1534_v29 = vadd.f32 %v1533_v25, %v1528_v28 }
 0xa47   :  { %1869 = vmatprep.mubr.msk.f32.mxu1 %vm42_vm0, %v1534_v29 }
 0xa48   :  { %1870 = vmatmul.mubr.msk.f32.vlgmr.msra.gmra.mrb[16].mxu1 %vm42_vm0, %v1535_v30 }
 0xb1b   :  { %v1871_v32 = vpop.f32.mrb[16].mxu1 }
 0xb1c   :  { %v1622_v33 = vadd.f32 %v1871_v32, %v1543_v31  ;;  %v1616_v34 = vpop.f32.mrb[17].mxu1 }
 0xb1d   :  { %v1617_v35 = vadd.f32 %v1616_v34, %v1543_v31 }
 0xb1e   :  { %1626 = vst [vmem:[%s2282_s3 + $0x8] sm:$0xff] %v1622_v33 }
 0xb1f   :  { %1625 = vst [vmem:[%s2282_s3] sm:$0xff] %v1617_v35 }
 0xb20   :  { %1631 = vsyncpa [#allocation3], 1 }

</bundles_post_ra>
